<compile_context>
chip_gen: v5e
topology: v5e:2x2
jax: 0.10.0
libtpu: 0.0.40
codegen_flags: <defaults>
</compile_context>

<pallas_src>
import jax
import jax.numpy as jnp
from jax.experimental import pallas as pl
from jax.experimental.pallas import tpu as pltpu


def _mlp_kernel(x_ref, w1_ref, b1_ref, w2_ref, b2_ref, w3_ref, b3_ref, o_ref):
    # fc1 + ReLU   (dropout = identity, eval mode)
    h1 = jnp.dot(x_ref[...], w1_ref[...], preferred_element_type=jnp.float32)
    h1 = jnp.maximum(h1 + b1_ref[...], 0.0)
    # fc2 + ReLU   (dropout = identity, eval mode)
    h2 = jnp.dot(h1, w2_ref[...], preferred_element_type=jnp.float32)
    h2 = jnp.maximum(h2 + b2_ref[...], 0.0)
    # fc3 (logits, no activation)
    out = jnp.dot(h2, w3_ref[...], preferred_element_type=jnp.float32)
    o_ref[...] = (out + b3_ref[...]).astype(o_ref.dtype)


def _round_up(n, m):
    return ((n + m - 1) // m) * m


def _cdiv(a, b):
    return -(-a // b)


def _pick_tile_b(B):
    """Batch tile size: one tile for small B; big tiles (>=2 grid steps) for large B."""
    if B <= 512:
        return max(8, _round_up(B, 8))
    # Large batch: fewer grid steps, but keep >= 2 so the "parallel" batch axis
    # can shard across v7x's two TensorCores.  Multiple of 256 keeps MXU M-pass full.
    return min(1024, max(256, _round_up(_cdiv(B, 2), 256)))


def prepare_params(params):
    """Pad feature axes to lane-dense multiples of 128 ONCE, outside the hot path.

    Padding is zeros, so results are numerically exact; padded logit columns are
    sliced off in the wrapper.
    """
    def pad2(a, rows, cols):
        return jnp.pad(a, ((0, rows - a.shape[0]), (0, cols - a.shape[1])))

    K, H1 = params["w1"].shape
    H2 = params["w2"].shape[1]
    N = params["w3"].shape[1]
    H1p = _round_up(H1, 128)   # 128 -> 128
    H2p = _round_up(H2, 128)   # 64  -> 128
    Np = _round_up(N, 128)     # 37  -> 128
    return {
        "w1": pad2(params["w1"], K, H1p).astype(jnp.float32),
        "b1": pad2(params["b1"], 1, H1p).astype(jnp.float32),
        "w2": pad2(params["w2"], H1p, H2p).astype(jnp.float32),
        "b2": pad2(params["b2"], 1, H2p).astype(jnp.float32),
        "w3": pad2(params["w3"], H2p, Np).astype(jnp.float32),
        "b3": pad2(params["b3"], 1, Np).astype(jnp.float32),
    }


def character_discriminator_forward(x, padded_params, num_characters):
    """x: [B, latent_dims] float32. padded_params: output of prepare_params().

    Returns [B, num_characters] float32 logits.
    """
    w1p, b1p = padded_params["w1"], padded_params["b1"]
    w2p, b2p = padded_params["w2"], padded_params["b2"]
    w3p, b3p = padded_params["w3"], padded_params["b3"]

    B, K = x.shape
    H1 = w1p.shape[1]
    H2 = w2p.shape[1]
    Np = w3p.shape[1]

    TB = _pick_tile_b(B)

    out = pl.pallas_call(
        _mlp_kernel,
        out_shape=jax.ShapeDtypeStruct((B, Np), jnp.float32),
        grid=(_cdiv(B, TB),),
        in_specs=[
            # x tile marches with the grid; last dim == full array dim (no 128 pad).
            pl.BlockSpec((TB, K), lambda i: (i, 0)),
            # Weights / biases stay VMEM-resident across all batch tiles.
            pl.BlockSpec((K, H1), lambda i: (0, 0)),
            pl.BlockSpec((1, H1), lambda i: (0, 0)),
            pl.BlockSpec((H1, H2), lambda i: (0, 0)),
            pl.BlockSpec((1, H2), lambda i: (0, 0)),
            pl.BlockSpec((H2, Np), lambda i: (0, 0)),
            pl.BlockSpec((1, Np), lambda i: (0, 0)),
        ],
        out_specs=pl.BlockSpec((TB, Np), lambda i: (i, 0)),
        compiler_params=pltpu.CompilerParams(
            dimension_semantics=("parallel",)),
    )(x, w1p, b1p, w2p, b2p, w3p, b3p)

    # Only a column slice remains (padded logit lanes); no row slice needed.
    return out[:, :num_characters]


def init_params(key, latent_dims, num_characters=37):
    """Deterministic init mimicking nn.Linear's U(-1/sqrt(fan_in), 1/sqrt(fan_in))."""
    dims = [(latent_dims, 128), (128, 64), (64, num_characters)]
    params = {}
    for i, (fan_in, fan_out) in enumerate(dims, start=1):
        key, kw, kb = jax.random.split(key, 3)
        bound = 1.0 / jnp.sqrt(float(fan_in))
        params[f"w{i}"] = jax.random.uniform(
            kw, (fan_in, fan_out), jnp.float32, -bound, bound)
        params[f"b{i}"] = jax.random.uniform(
            kb, (1, fan_out), jnp.float32, -bound, bound)
    return params


def reference_forward_f32(x, params):
    h1 = jnp.maximum(x @ params["w1"] + params["b1"], 0.0)
    h2 = jnp.maximum(h1 @ params["w2"] + params["b2"], 0.0)
    return h2 @ params["w3"] + params["b3"]


if __name__ == "__main__":
    key = jax.random.PRNGKey(0)
    latent_dims = 32
    num_characters = 37
    batch = 2

    k_params, k_x = jax.random.split(key)
    params = init_params(k_params, latent_dims, num_characters)
    padded_params = prepare_params(params)           # one-time, outside hot path
    x = jax.random.normal(k_x, (batch, latent_dims), dtype=jnp.float32)

    out = character_discriminator_forward(x, padded_params, num_characters)
    out = jax.block_until_ready(out)

    assert out.shape == (batch, num_characters), out.shape
    ref = reference_forward_f32(x, params)
    assert jnp.allclose(out, ref, atol=1e-3, rtol=1e-3), "mismatch vs f32 reference"

    print("KERNEL_OK")
</pallas_src>

<mosaic_0001>
module attributes {stable_mosaic.version = 11 : i64} {
  func.func @_mlp_kernel(%arg0: i32, %arg1: memref<8x32xf32, #tpu.memory_space<vmem>>, %arg2: memref<32x128xf32, #tpu.memory_space<vmem>>, %arg3: memref<1x128xf32, #tpu.memory_space<vmem>>, %arg4: memref<128x128xf32, #tpu.memory_space<vmem>>, %arg5: memref<1x128xf32, #tpu.memory_space<vmem>>, %arg6: memref<128x128xf32, #tpu.memory_space<vmem>>, %arg7: memref<1x128xf32, #tpu.memory_space<vmem>>, %arg8: memref<8x128xf32, #tpu.memory_space<vmem>>) attributes {dimension_semantics = [#tpu.dimension_semantics<parallel>], iteration_bounds = array<i64: 1>, scalar_prefetch = 0 : i64, scratch_operands = 0 : i64, tpu.core_type = #tpu.core_type<tc>, window_params = [{transform_indices = @transform_0, window_bounds = array<i64: 8, 32>}, {pipeline_mode = #tpu.pipeline_mode<synchronous>, transform_indices = @transform_1, window_bounds = array<i64: 32, 128>}, {pipeline_mode = #tpu.pipeline_mode<synchronous>, transform_indices = @transform_2, window_bounds = array<i64: 1, 128>}, {pipeline_mode = #tpu.pipeline_mode<synchronous>, transform_indices = @transform_3, window_bounds = array<i64: 128, 128>}, {pipeline_mode = #tpu.pipeline_mode<synchronous>, transform_indices = @transform_4, window_bounds = array<i64: 1, 128>}, {pipeline_mode = #tpu.pipeline_mode<synchronous>, transform_indices = @transform_5, window_bounds = array<i64: 128, 128>}, {pipeline_mode = #tpu.pipeline_mode<synchronous>, transform_indices = @transform_6, window_bounds = array<i64: 1, 128>}, {transform_indices = @transform_7, window_bounds = array<i64: 8, 128>}]} {
    %c0 = arith.constant 0 : index
    %c0_0 = arith.constant 0 : index
    %0 = vector.load %arg1[%c0, %c0_0] : memref<8x32xf32, #tpu.memory_space<vmem>>, vector<8x32xf32>
    %c0_1 = arith.constant 0 : index
    %c0_2 = arith.constant 0 : index
    %1 = vector.load %arg2[%c0_1, %c0_2] : memref<32x128xf32, #tpu.memory_space<vmem>>, vector<32x128xf32>
    %cst = arith.constant dense<0.000000e+00> : vector<8x128xf32>
    %2 = tpu.matmul %0, %1, %cst {dimension_numbers = #tpu.dot_dimension_numbers<[1], [0], [0], [1], [0, 0, 1, 1], [], []>} : vector<8x32xf32>, vector<32x128xf32>, vector<8x128xf32> -> vector<8x128xf32>
    %c0_3 = arith.constant 0 : index
    %c0_4 = arith.constant 0 : index
    %3 = vector.load %arg3[%c0_3, %c0_4] : memref<1x128xf32, #tpu.memory_space<vmem>>, vector<1x128xf32>
    %4 = vector.broadcast %3 : vector<1x128xf32> to vector<8x128xf32>
    %5 = arith.addf %2, %4 : vector<8x128xf32>
    %cst_5 = arith.constant 0.000000e+00 : f32
    %6 = vector.broadcast %cst_5 : f32 to vector<8x128xf32>
    %7 = arith.maximumf %5, %6 : vector<8x128xf32>
    %c0_6 = arith.constant 0 : index
    %c0_7 = arith.constant 0 : index
    %8 = vector.load %arg4[%c0_6, %c0_7] : memref<128x128xf32, #tpu.memory_space<vmem>>, vector<128x128xf32>
    %cst_8 = arith.constant dense<0.000000e+00> : vector<8x128xf32>
    %9 = tpu.matmul %7, %8, %cst_8 {dimension_numbers = #tpu.dot_dimension_numbers<[1], [0], [0], [1], [0, 0, 1, 1], [], []>} : vector<8x128xf32>, vector<128x128xf32>, vector<8x128xf32> -> vector<8x128xf32>
    %c0_9 = arith.constant 0 : index
    %c0_10 = arith.constant 0 : index
    %10 = vector.load %arg5[%c0_9, %c0_10] : memref<1x128xf32, #tpu.memory_space<vmem>>, vector<1x128xf32>
    %11 = vector.broadcast %10 : vector<1x128xf32> to vector<8x128xf32>
    %12 = arith.addf %9, %11 : vector<8x128xf32>
    %cst_11 = arith.constant 0.000000e+00 : f32
    %13 = vector.broadcast %cst_11 : f32 to vector<8x128xf32>
    %14 = arith.maximumf %12, %13 : vector<8x128xf32>
    %c0_12 = arith.constant 0 : index
    %c0_13 = arith.constant 0 : index
    %15 = vector.load %arg6[%c0_12, %c0_13] : memref<128x128xf32, #tpu.memory_space<vmem>>, vector<128x128xf32>
    %cst_14 = arith.constant dense<0.000000e+00> : vector<8x128xf32>
    %16 = tpu.matmul %14, %15, %cst_14 {dimension_numbers = #tpu.dot_dimension_numbers<[1], [0], [0], [1], [0, 0, 1, 1], [], []>} : vector<8x128xf32>, vector<128x128xf32>, vector<8x128xf32> -> vector<8x128xf32>
    %c0_15 = arith.constant 0 : index
    %c0_16 = arith.constant 0 : index
    %17 = vector.load %arg7[%c0_15, %c0_16] : memref<1x128xf32, #tpu.memory_space<vmem>>, vector<1x128xf32>
    %18 = vector.broadcast %17 : vector<1x128xf32> to vector<8x128xf32>
    %19 = arith.addf %16, %18 : vector<8x128xf32>
    %c0_17 = arith.constant 0 : index
    %c0_18 = arith.constant 0 : index
    %20 = vector.load %arg8[%c0_17, %c0_18] : memref<8x128xf32, #tpu.memory_space<vmem>>, vector<8x128xf32>
    tpu.vector_store %arg8[%c0_17, %c0_18], %19 {strides = array<i32>} : memref<8x128xf32, #tpu.memory_space<vmem>>, vector<8x128xf32>,
    return
  }
  func.func @transform_0(%arg0: i32) -> (i32, i32) {
    %c0_i32 = arith.constant 0 : i32
    %c0_i32_0 = arith.constant 0 : i32
    return %arg0, %c0_i32 : i32, i32
  }
  func.func @transform_1(%arg0: i32) -> (i32, i32) {
    %c0_i32 = arith.constant 0 : i32
    %c0_i32_0 = arith.constant 0 : i32
    %c0_i32_1 = arith.constant 0 : i32
    return %c0_i32, %c0_i32_0 : i32, i32
  }
  func.func @transform_2(%arg0: i32) -> (i32, i32) {
    %c0_i32 = arith.constant 0 : i32
    %c0_i32_0 = arith.constant 0 : i32
    %c0_i32_1 = arith.constant 0 : i32
    return %c0_i32, %c0_i32_0 : i32, i32
  }
  func.func @transform_3(%arg0: i32) -> (i32, i32) {
    %c0_i32 = arith.constant 0 : i32
    %c0_i32_0 = arith.constant 0 : i32
    %c0_i32_1 = arith.constant 0 : i32
    return %c0_i32, %c0_i32_0 : i32, i32
  }
  func.func @transform_4(%arg0: i32) -> (i32, i32) {
    %c0_i32 = arith.constant 0 : i32
    %c0_i32_0 = arith.constant 0 : i32
    %c0_i32_1 = arith.constant 0 : i32
    return %c0_i32, %c0_i32_0 : i32, i32
  }
  func.func @transform_5(%arg0: i32) -> (i32, i32) {
    %c0_i32 = arith.constant 0 : i32
    %c0_i32_0 = arith.constant 0 : i32
    %c0_i32_1 = arith.constant 0 : i32
    return %c0_i32, %c0_i32_0 : i32, i32
  }
  func.func @transform_6(%arg0: i32) -> (i32, i32) {
    %c0_i32 = arith.constant 0 : i32
    %c0_i32_0 = arith.constant 0 : i32
    %c0_i32_1 = arith.constant 0 : i32
    return %c0_i32, %c0_i32_0 : i32, i32
  }
  func.func @transform_7(%arg0: i32) -> (i32, i32) {
    %c0_i32 = arith.constant 0 : i32
    %c0_i32_0 = arith.constant 0 : i32
    return %arg0, %c0_i32 : i32, i32
  }
}

</mosaic_0001>

<bundles_post_ra>
// kernel: tpu_custom_call.1
= control target key start
LH: loop header
LB: loop body
LE: loop exit
PB: predicated region body
PF: predicated region fallthrough
CT: control target
= control target key end

     0   :  { %12 = vsyncpa [#allocation3], 0  ;;  %s447_s0 = inlined_call_operand.hbm [shape: f32[2,32], index: 0, kind: input, shape index: {}]   ;;  %s448_s1 = inlined_call_operand.hbm [shape: f32[32,128], index: 1, kind: input, shape index: {}]   ;;  %s449_s2 = inlined_call_operand.vmem [shape: f32[1,128], index: 2, kind: input, shape index: {}]   ;;  %s450_s3 = inlined_call_operand.hbm [shape: f32[128,128], index: 3, kind: input, shape index: {}]   ;;  %s451_s4 = inlined_call_operand.vmem [shape: f32[1,128], index: 4, kind: input, shape index: {}]   ;;  %s452_s5 = inlined_call_operand.hbm [shape: f32[128,128], index: 5, kind: input, shape index: {}]   ;;  %s453_s6 = inlined_call_operand.vmem [shape: f32[1,128], index: 6, kind: input, shape index: {}]   ;;  %s454_s7 = inlined_call_operand.hbm [shape: f32[2,128], index: 7, kind: output, shape index: {}]  }
   0x1   :  { %13 = vsyncpa [#allocation6], 0 }
   0x2   :  { %14 = vsyncpa [#allocation9], 0 }
   0x3   :  { %15 = vsyncpa [#allocation4], 0  ;;  %s33_s26 = sshll.u32 %s448_s1, 4  ;;  %s34_s26 = int_to_ptr.hbm [resolvable:$true] %s33_s26 }
   0x4   :  { %19 = vsyncadd [#allocation3], 96  ;;  %s368_s27 = smov [#allocation5]   ;;  %s20_s8 = sshll.u32 %s447_s0, 4  ;;  %s21_s8 = int_to_ptr.hbm [resolvable:$true] %s20_s8 }
   0x5   :  { %s35_s28 = sshll.u32 %s368_s27, 4  ;;  %s369_s9 = smov 128   ;;  %s36_s28 = int_to_ptr.vmem [resolvable:$true] %s35_s28 }
   0x6   :  { %s370_s10 = smov 8   ;;  %s371_s11 = smov [#allocation2]  }
   0x7   :  { %41 = dma.hbm_to_vmem [thread:$0]  %s34_s26, 512, %s36_s28, [#allocation6], %s369_s9, %s369_s9, %s370_s10  }
   0x8   :  { %s22_s12 = sshll.u32 %s371_s11, 4  ;;  %s372_s13 = smov 32   ;;  %s23_s12 = int_to_ptr.vmem [resolvable:$true] %s22_s12 }
   0x9   :  { %s373_s14 = smov 2   ;;  %s48_s16 = sshll.u32 %s450_s3, 4  ;;  %s49_s16 = int_to_ptr.hbm [resolvable:$true] %s48_s16 }
   0xa   :  { %28 = dma.hbm_to_vmem [thread:$0]  %s21_s8, 32, %s23_s12, [#allocation3], %s372_s13, %s372_s13, %s373_s14  }
   0xb   :  { %s374_s17 = smov [#allocation7]   ;;  %s63_s20 = sshll.u32 %s452_s5, 4  ;;  %s64_s20 = int_to_ptr.hbm [resolvable:$true] %s63_s20 }
   0xc   :  { %s50_s0 = sshll.u32 %s374_s17, 4  ;;  %s375_s21 = smov [#allocation8]   ;;  %s51_s0 = int_to_ptr.vmem [resolvable:$true] %s50_s0 }
   0xd   :  { %56 = dma.hbm_to_vmem [thread:$0]  %s49_s16, 2048, %s51_s0, [#allocation6], %s369_s9, %s369_s9, %s370_s10  }
   0xe   :  { %s65_s22 = sshll.u32 %s375_s21, 4  ;;  %s66_s22 = int_to_ptr.vmem [resolvable:$true] %s65_s22 }
   0xf   :  { %71 = dma.hbm_to_vmem [thread:$0]  %s64_s20, 2048, %s66_s22, [#allocation9], %s369_s9, %s369_s9, %s370_s10  }
  0x10   :  { %360 = dma.done.wait [#allocation3], 128  }
  0x11   :  { %361 = vsyncadd [#allocation3], 4294967168 }
  0x12   :  { %362 = dma.done.wait [#allocation6], 2560  }
  0x13   :  { %363 = vsyncadd [#allocation6], 4294964736 }
  0x14   :  { %364 = dma.done.wait [#allocation9], 2048  }
  0x15   :  { %365 = vsyncadd [#allocation9], 4294965248  ;;  %v94_v0 = vld [vmem:[#allocation5 + $0x18] sm:$0xff]  ;;  %v93_v1 = vld [vmem:[#allocation5 + $0x10] sm:$0xff]  ;;  %vm99_vm0 = vcmask 261120  }
  0x16   :  { %115 = vmatpush.msra.mxu0 %v94_v0  ;;  %v139_v2 = vld [vmem:[#allocation7 + $0x78] sm:$0xff]  ;;  %v92_v3 = vld [vmem:[#allocation5 + $0x8] sm:$0xff]  ;;  %v138_v4 = vld [vmem:[#allocation7 + $0x70] sm:$0xff] }
  0x17   :  { %144 = vmatpush.msra.mxu1 %v139_v2  ;;  %v137_v5 = vld [vmem:[#allocation7 + $0x68] sm:$0xff]  ;;  %v91_v6 = vld [vmem:[#allocation5] sm:$0xff]  ;;  %v90_v7 = vld [vmem:[#allocation2] sm:$0xff] }
  0x18   :  { %116 = vmatpush.msra.mxu0 %v93_v1  ;;  %v136_v8 = vld [vmem:[#allocation7 + $0x60] sm:$0xff]  ;;  %v135_v9 = vld [vmem:[#allocation7 + $0x58] sm:$0xff]  ;;  %v134_v10 = vld [vmem:[#allocation7 + $0x50] sm:$0xff] }
  0x19   :  { %145 = vmatpush.msra.mxu1 %v138_v4  ;;  %v133_v11 = vld [vmem:[#allocation7 + $0x48] sm:$0xff]  ;;  %v132_v12 = vld [vmem:[#allocation7 + $0x40] sm:$0xff]  ;;  %v131_v13 = vld [vmem:[#allocation7 + $0x38] sm:$0xff] }
  0x1a   :  { %117 = vmatpush.msra.mxu0 %v92_v3  ;;  %v130_v14 = vld [vmem:[#allocation7 + $0x30] sm:$0xff]  ;;  %v129_v15 = vld [vmem:[#allocation7 + $0x28] sm:$0xff]  ;;  %v128_v16 = vld [vmem:[#allocation7 + $0x20] sm:$0xff] }
  0x1b   :  { %146 = vmatpush.msra.mxu1 %v137_v5  ;;  %v127_v17 = vld [vmem:[#allocation7 + $0x18] sm:$0xff]  ;;  %v126_v18 = vld [vmem:[#allocation7 + $0x10] sm:$0xff]  ;;  %v125_v19 = vld [vmem:[#allocation7 + $0x8] sm:$0xff] }
  0x1c   :  { %118 = vmatpush.msra.mxu0 %v91_v6  ;;  %v124_v20 = vld [vmem:[#allocation7] sm:$0xff]  ;;  %v180_v21 = vld [vmem:[#allocation8 + $0x78] sm:$0xff]  ;;  %v179_v22 = vld [vmem:[#allocation8 + $0x70] sm:$0xff] }
  0x1d   :  { %227 = vmatmul.msk.f32.vlgmr.msra.gmra.mxu0 %vm99_vm0, %v90_v7  ;;  %147 = vmatpush.msra.mxu1 %v136_v8  ;;  %v178_v23 = vld [vmem:[#allocation8 + $0x68] sm:$0xff]  ;;  %v177_v24 = vld [vmem:[#allocation8 + $0x60] sm:$0xff]  ;;  %v176_v25 = vld [vmem:[#allocation8 + $0x58] sm:$0xff] }
  0x1e   :  { %185 = vmatpush.msra.mxu2 %v180_v21  ;;  %v175_v26 = vld [vmem:[#allocation8 + $0x50] sm:$0xff]  ;;  %v174_v27 = vld [vmem:[#allocation8 + $0x48] sm:$0xff]  ;;  %v173_v28 = vld [vmem:[#allocation8 + $0x40] sm:$0xff] }
  0x1f   :  { %148 = vmatpush.msra.mxu1 %v135_v9  ;;  %v172_v29 = vld [vmem:[#allocation8 + $0x38] sm:$0xff]  ;;  %v171_v30 = vld [vmem:[#allocation8 + $0x30] sm:$0xff]  ;;  %v170_v31 = vld [vmem:[#allocation8 + $0x28] sm:$0xff] }
  0x20   :  { %186 = vmatpush.msra.mxu2 %v179_v22  ;;  %v169_v32 = vld [vmem:[#allocation8 + $0x20] sm:$0xff]  ;;  %v168_v33 = vld [vmem:[#allocation8 + $0x18] sm:$0xff]  ;;  %v167_v38 = vld [vmem:[#allocation8 + $0x10] sm:$0xff] }
  0x21   :  { %149 = vmatpush.msra.mxu1 %v134_v10  ;;  %v237_v34 = vld [vmem:[%s449_s2] ss:$0 sm:$0xff]  ;;  %v166_v39 = vld [vmem:[#allocation8 + $0x8] sm:$0xff]  ;;  %v165_v40 = vld [vmem:[#allocation8] sm:$0xff] }
  0x22   :  { %187 = vmatpush.msra.mxu2 %v178_v23  ;;  %v238_v41 = vld [vmem:[%s451_s4] ss:$0 sm:$0xff] }
  0x23   :  { %150 = vmatpush.msra.mxu1 %v133_v11  ;;  %v239_v45 = vld [vmem:[%s453_s6] ss:$0 sm:$0xff] }
  0x24   :  { %188 = vmatpush.msra.mxu2 %v177_v24 }
  0x25   :  { %151 = vmatpush.msra.mxu1 %v132_v12 }
  0x26   :  { %189 = vmatpush.msra.mxu2 %v176_v25 }
  0x27   :  { %152 = vmatpush.msra.mxu1 %v131_v13 }
  0x28   :  { %190 = vmatpush.msra.mxu2 %v175_v26 }
  0x29   :  { %153 = vmatpush.msra.mxu1 %v130_v14 }
  0x2a   :  { %191 = vmatpush.msra.mxu2 %v174_v27 }
  0x2b   :  { %154 = vmatpush.msra.mxu1 %v129_v15 }
  0x2c   :  { %192 = vmatpush.msra.mxu2 %v173_v28 }
  0x2d   :  { %155 = vmatpush.msra.mxu1 %v128_v16 }
  0x2e   :  { %193 = vmatpush.msra.mxu2 %v172_v29 }
  0x2f   :  { %156 = vmatpush.msra.mxu1 %v127_v17 }
  0x30   :  { %194 = vmatpush.msra.mxu2 %v171_v30 }
  0x31   :  { %157 = vmatpush.msra.mxu1 %v126_v18 }
  0x32   :  { %195 = vmatpush.msra.mxu2 %v170_v31 }
  0x33   :  { %158 = vmatpush.msra.mxu1 %v125_v19 }
  0x34   :  { %196 = vmatpush.msra.mxu2 %v169_v32 }
  0x35   :  { %159 = vmatpush.msra.mxu1 %v124_v20 }
  0x36   :  { %197 = vmatpush.msra.mxu2 %v168_v33 }
  0x38   :  { %198 = vmatpush.msra.mxu2 %v167_v38 }
  0x3a   :  { %199 = vmatpush.msra.mxu2 %v166_v39 }
  0x3c   :  { %200 = vmatpush.msra.mxu2 %v165_v40 }
  0x9a   :  { %v120_v35 = vpop.f32.mrf.mxu0 }
  0x9b   :  { %v121_v36 = vadd.f32 %v237_v34, %v120_v35 }
  0x9d   :  { %v123_v37 = vmax.f32 %v121_v36, 0.0 }
  0x9f   :  { %160 = vmatmul.f32.vlgmr.msra.gmra.mxu1 %v123_v37 }
 0x11c   :  { %v161_v42 = vpop.f32.mrf.mxu1 }
 0x11d   :  { %v162_v43 = vadd.f32 %v238_v41, %v161_v42 }
 0x11f   :  { %v164_v44 = vmax.f32 %v162_v43, 0.0 }
 0x121   :  { %201 = vmatmul.f32.vlgmr.msra.gmra.mxu2 %v164_v44 }
 0x1a4   :  { %v202_v46 = vpop.f32.mrf.mxu2 }
 0x1a5   :  { %v203_v47 = vadd.f32 %v239_v45, %v202_v46 }
 0x1a7   :  { %205 = vst [vmem:[#allocation10] sm:$0xff] %v203_v47 }
 0x1a8   :  { %209 = vsyncadd [#allocation4], 96  ;;  %s212_s28 = sshll.u32 %s454_s7, 4  ;;  %s376_s29 = smov [#allocation10]   ;;  %s213_s28 = int_to_ptr.hbm [resolvable:$true] %s212_s28 }
 0x1a9   :  { %s210_s30 = sshll.u32 %s376_s29, 4  ;;  %s211_s30 = int_to_ptr.vmem [resolvable:$true] %s210_s30 }
 0x1aa   :  { %218 = dma.vmem_to_hbm [thread:$0]  %s211_s30, 32, %s213_s28, [#allocation4], %s372_s13, %s372_s13, %s373_s14  }
 0x1ab   :  { %366 = dma.done.wait [#allocation4], 128  }
 0x1ac   :  { %367 = vsyncadd [#allocation4], 4294967168 }
 0x1ad   :  { %223 = vsyncpa [#allocation3], 1 }
 0x1ae   :  { %224 = vsyncpa [#allocation6], 1 }
 0x1af   :  { %225 = vsyncpa [#allocation9], 1 }
 0x1b0   :  { %226 = vsyncpa [#allocation4], 1 }

</bundles_post_ra>
